<compile_context>
chip_gen: v6e
topology: v6e:2x2x1
jax: 0.10.0
libtpu: 0.0.40
codegen_flags: <defaults>
</compile_context>

<pallas_src>
import functools

import jax
import jax.numpy as jnp
from jax import lax
from jax.experimental import pallas as pl
from jax.experimental.pallas import tpu as pltpu


def _channel_attention_kernel(
    x_ref,        # [1, C, TS]   current spatial tile of one batch row
    w1a_ref,      # [C, HID]     fc1 weight rows for the "avg" half, transposed
    w1b_ref,      # [C, HID]     fc1 weight rows for the "max" half, transposed
    b1_ref,       # [1, HID]
    w2_ref,       # [HID, C]     fc2 weight, transposed (in, out)
    b2_ref,       # [1, C]
    o_ref,        # [1, 1, C]    attention weights for this batch row
    sum_ref,      # VMEM scratch [C, 1] f32 : running sum over S
    max_ref,      # VMEM scratch [C, 1] f32 : running max over S
    *,
    spatial_size,
    tile_s,
):
    k = pl.program_id(1)
    num_k = pl.num_programs(1)

    # ---- init accumulators at the first spatial tile of each batch row ----
    @pl.when(k == 0)
    def _init():
        sum_ref[...] = jnp.zeros_like(sum_ref)
        max_ref[...] = jnp.full_like(max_ref, -jnp.inf)

    # ---- streaming pooling over this spatial tile ----
    x = x_ref[0].astype(jnp.float32)                      # [C, TS]
    rem = spatial_size % tile_s                           # static Python int

    if rem == 0:
        # Every tile is fully valid: plain unmasked accumulate everywhere.
        sum_ref[...] += jnp.sum(x, axis=-1, keepdims=True)
        max_ref[...] = jnp.maximum(
            max_ref[...], jnp.max(x, axis=-1, keepdims=True))
    else:
        # Interior tiles: cheap unmasked accumulate (no iota / selects).
        @pl.when(k < num_k - 1)
        def _interior():
            sum_ref[...] += jnp.sum(x, axis=-1, keepdims=True)
            max_ref[...] = jnp.maximum(
                max_ref[...], jnp.max(x, axis=-1, keepdims=True))

        # Last (ragged) tile only: mask padded lanes with a *static* mask.
        @pl.when(k == num_k - 1)
        def _ragged_last():
            col = lax.broadcasted_iota(jnp.int32, x.shape, 1)   # [C, TS]
            valid = col < rem                                   # static bound
            x_for_sum = jnp.where(valid, x, 0.0)
            x_for_max = jnp.where(valid, x, -jnp.inf)
            sum_ref[...] += jnp.sum(x_for_sum, axis=-1, keepdims=True)
            max_ref[...] = jnp.maximum(
                max_ref[...], jnp.max(x_for_max, axis=-1, keepdims=True))

    # ---- finalize: MLP + sigmoid, once per batch row ----
    @pl.when(k == num_k - 1)
    def _finalize():
        avg_col = sum_ref[...] * (1.0 / spatial_size)      # [C, 1]
        max_col = max_ref[...]                             # [C, 1]

        # fc1 without concat: h = avg @ W1a + max @ W1b + b1
        # (broadcast-multiply + sublane reduce; no transposes needed).
        h = (jnp.sum(w1a_ref[...] * avg_col, axis=0, keepdims=True)
             + jnp.sum(w1b_ref[...] * max_col, axis=0, keepdims=True)
             + b1_ref[...])                                # [1, HID]
        h = jnp.maximum(h, 0.0)                            # ReLU

        out = jnp.dot(h, w2_ref[...],
                      preferred_element_type=jnp.float32) + b2_ref[...]  # [1, C]
        o_ref[0] = jax.nn.sigmoid(out).astype(o_ref.dtype)


def _block_budget():
    """Per-generation (target_block_bytes, vmem_limit_bytes)."""
    # Conservative default = v7x-safe (64 MiB VMEM per TensorCore).
    target_block = 8 * 1024 * 1024
    vmem_limit = 40 * 1024 * 1024
    try:
        vmem_cap = pltpu.get_tpu_info().vmem_capacity_bytes
        if vmem_cap >= 100 * 1024 * 1024:   # v5e / v6e: 128 MiB VMEM
            target_block = 16 * 1024 * 1024
            vmem_limit = 64 * 1024 * 1024
    except Exception:
        pass  # fall back to the conservative settings
    return target_block, vmem_limit


def _pick_spatial_tile(channels, spatial, itemsize, target_block_bytes):
    """Spatial tile: full S if it fits in one block, else biggest 128-multiple."""
    lane = 128
    max_ts = (target_block_bytes // max(channels * itemsize, 1)) // lane * lane
    # >=512-lane floor keeps per-channel DMA chunks >=2 KiB (helps v5e HBM).
    max_ts = max(max_ts, 4 * lane)
    if max_ts >= spatial:
        # One block covers the whole spatial axis: use the exact size so there
        # is no ragged masking and no read past the end of S.
        return int(spatial)
    return int(max_ts)


def channel_attention(x, w1, b1, w2, b2, *, tile_s=None):
    """x: [B, C, D, H, W]. Returns [B, C] attention weights.

    w1: [2C*r, 2C] (PyTorch nn.Linear layout), b1: [2C*r]
    w2: [C, 2C*r],                             b2: [C]
    """
    B, C, D, H, W = x.shape
    S = D * H * W
    hidden = w1.shape[0]
    assert w1.shape == (hidden, 2 * C)
    assert w2.shape == (C, hidden)

    x_flat = x.reshape(B, C, S)
    target_block_bytes, vmem_limit_bytes = _block_budget()
    if tile_s is None:
        tile_s = _pick_spatial_tile(
            C, S, x_flat.dtype.itemsize, target_block_bytes)
    assert tile_s % 128 == 0 or tile_s == S
    num_s_tiles = pl.cdiv(S, tile_s)

    # Host-side weight prep: split fc1 into avg/max halves and transpose to
    # (in, out); reshape biases to 2-D rows. Avoids any in-kernel concat or
    # transpose.
    w1a_t = jnp.transpose(w1[:, :C])          # [C, HID]
    w1b_t = jnp.transpose(w1[:, C:])          # [C, HID]
    b1_row = b1.reshape(1, hidden)            # [1, HID]
    w2_t = jnp.transpose(w2)                  # [HID, C]
    b2_row = b2.reshape(1, C)                 # [1, C]

    kernel = functools.partial(
        _channel_attention_kernel, spatial_size=S, tile_s=tile_s)

    itemsize = x_flat.dtype.itemsize
    weight_bytes = sum(int(a.size) * a.dtype.itemsize
                       for a in (w1a_t, w1b_t, b1_row, w2_t, b2_row))
    cost = pl.CostEstimate(
        flops=int(3 * B * C * S + B * (4 * C * hidden + 2 * hidden * C)),
        transcendentals=int(B * C),
        bytes_accessed=int(B * C * S * itemsize + weight_bytes
                           + B * C * itemsize),
    )

    # TODO(synk): for v7x with B == 1 a parallel C-tile grid axis (with the MLP
    # hoisted out of the kernel) would recover 2x megacore HBM utilization.
    out = pl.pallas_call(
        kernel,
        out_shape=jax.ShapeDtypeStruct((B, 1, C), x.dtype),
        grid_spec=pltpu.PrefetchScalarGridSpec(
            num_scalar_prefetch=0,
            grid=(B, num_s_tiles),
            in_specs=[
                pl.BlockSpec((1, C, tile_s), lambda b, k: (b, 0, k)),
                pl.BlockSpec((C, hidden), lambda b, k: (0, 0)),
                pl.BlockSpec((C, hidden), lambda b, k: (0, 0)),
                pl.BlockSpec((1, hidden), lambda b, k: (0, 0)),
                pl.BlockSpec((hidden, C), lambda b, k: (0, 0)),
                pl.BlockSpec((1, C), lambda b, k: (0, 0)),
            ],
            out_specs=pl.BlockSpec((1, 1, C), lambda b, k: (b, 0, 0)),
            scratch_shapes=[
                pltpu.VMEM((C, 1), jnp.float32),   # running sum
                pltpu.VMEM((C, 1), jnp.float32),   # running max
            ],
        ),
        compiler_params=pltpu.CompilerParams(
            dimension_semantics=("parallel", "arbitrary"),
            vmem_limit_bytes=vmem_limit_bytes,
        ),
        cost_estimate=cost,
    )(x_flat, w1a_t, w1b_t, b1_row, w2_t, b2_row)
    return out.reshape(B, C)


def channel_attention_ref(x, w1, b1, w2, b2):
    """Pure-JAX reference mirroring the PyTorch module."""
    x_avg = jnp.mean(x, axis=(2, 3, 4))
    x_max = jnp.max(x, axis=(2, 3, 4))
    feat = jnp.concatenate([x_avg, x_max], axis=1)
    h = jnp.maximum(feat @ w1.T + b1, 0.0)
    return jax.nn.sigmoid(h @ w2.T + b2)


if __name__ == "__main__":
    key = jax.random.PRNGKey(0)
    k_x, k_w1, k_b1, k_w2, k_b2 = jax.random.split(key, 5)

    # Small shapes consistent with the module (5-D NCDHW input).
    # S = 7*8*9 = 504: auto path uses a single exact-size (504) tile;
    # forced tile_s=128 exercises init / unmasked interior / ragged-last /
    # finalize.
    B, C, D, H, W = 2, 4, 7, 8, 9
    ratio = 2
    in_feat = 2 * C                 # fc1 in  = 8
    hidden = in_feat * ratio        # fc1 out = 16

    x = jax.random.normal(k_x, (B, C, D, H, W), dtype=jnp.float32)

    # Deterministic synthetic parameters (shapes follow nn.Linear).
    w1 = 0.1 * jax.random.normal(k_w1, (hidden, in_feat), dtype=jnp.float32)
    b1 = 0.1 * jax.random.normal(k_b1, (hidden,), dtype=jnp.float32)
    w2 = 0.1 * jax.random.normal(k_w2, (C, hidden), dtype=jnp.float32)
    b2 = 0.1 * jax.random.normal(k_b2, (C,), dtype=jnp.float32)

    ref = channel_attention_ref(x, w1, b1, w2, b2)

    # Auto-picked spatial tile (single exact-size S block, no masking).
    out_auto = jax.block_until_ready(channel_attention(x, w1, b1, w2, b2))
    # Forced small tile: exercises the gated ragged-last-tile masking path.
    out_tiled = jax.block_until_ready(
        channel_attention(x, w1, b1, w2, b2, tile_s=128))

    assert out_auto.shape == (B, C)
    assert jnp.allclose(out_auto, ref, atol=1e-5, rtol=1e-5), (out_auto, ref)
    assert jnp.allclose(out_tiled, ref, atol=1e-5, rtol=1e-5), (out_tiled, ref)

    print("KERNEL_OK")
</pallas_src>

<mosaic_0001>
module attributes {stable_mosaic.version = 11 : i64} {
  func.func @_channel_attention_kernel(%arg0: i32, %arg1: i32, %arg2: memref<1x4x504xf32, #tpu.memory_space<vmem>>, %arg3: memref<4x16xf32, #tpu.memory_space<vmem>>, %arg4: memref<4x16xf32, #tpu.memory_space<vmem>>, %arg5: memref<1x16xf32, #tpu.memory_space<vmem>>, %arg6: memref<16x4xf32, #tpu.memory_space<vmem>>, %arg7: memref<1x4xf32, #tpu.memory_space<vmem>>, %arg8: memref<1x1x4xf32, #tpu.memory_space<vmem>>, %arg9: memref<4x1xf32, #tpu.memory_space<vmem>>, %arg10: memref<4x1xf32, #tpu.memory_space<vmem>>) attributes {dimension_semantics = [#tpu.dimension_semantics<parallel>, #tpu.dimension_semantics<arbitrary>], iteration_bounds = array<i64: 2, 1>, scalar_prefetch = 0 : i64, scratch_operands = 2 : i64, tpu.core_type = #tpu.core_type<tc>, window_params = [{transform_indices = @transform_0, window_bounds = array<i64: 1, 4, 504>}, {pipeline_mode = #tpu.pipeline_mode<synchronous>, transform_indices = @transform_1, window_bounds = array<i64: 4, 16>}, {pipeline_mode = #tpu.pipeline_mode<synchronous>, transform_indices = @transform_2, window_bounds = array<i64: 4, 16>}, {pipeline_mode = #tpu.pipeline_mode<synchronous>, transform_indices = @transform_3, window_bounds = array<i64: 1, 16>}, {pipeline_mode = #tpu.pipeline_mode<synchronous>, transform_indices = @transform_4, window_bounds = array<i64: 16, 4>}, {pipeline_mode = #tpu.pipeline_mode<synchronous>, transform_indices = @transform_5, window_bounds = array<i64: 1, 4>}, {transform_indices = @transform_6, window_bounds = array<i64: 1, 1, 4>}]} {
    %c0_i32 = arith.constant 0 : i32
    %0 = arith.cmpi eq, %arg1, %c0_i32 : i32
    %1 = arith.extui %0 : i1 to i32
    %c0_i32_0 = arith.constant 0 : i32
    %2 = arith.cmpi ne, %1, %c0_i32_0 : i32
    scf.if %2 {
      %cst_14 = arith.constant 0.000000e+00 : f32
      %18 = vector.broadcast %cst_14 : f32 to vector<4x1xf32>
      %c0_15 = arith.constant 0 : index
      %c0_16 = arith.constant 0 : index
      %19 = vector.load %arg9[%c0_15, %c0_16] : memref<4x1xf32, #tpu.memory_space<vmem>>, vector<4x1xf32>
      tpu.vector_store %arg9[%c0_15, %c0_16], %18 {strides = array<i32>} : memref<4x1xf32, #tpu.memory_space<vmem>>, vector<4x1xf32>,
      %cst_17 = arith.constant 0xFF800000 : f32
      %20 = vector.broadcast %cst_17 : f32 to vector<4x1xf32>
      %c0_18 = arith.constant 0 : index
      %c0_19 = arith.constant 0 : index
      %21 = vector.load %arg10[%c0_18, %c0_19] : memref<4x1xf32, #tpu.memory_space<vmem>>, vector<4x1xf32>
      tpu.vector_store %arg10[%c0_18, %c0_19], %20 {strides = array<i32>} : memref<4x1xf32, #tpu.memory_space<vmem>>, vector<4x1xf32>,
    } else {
    }
    %c0 = arith.constant 0 : index
    %c0_1 = arith.constant 0 : index
    %c0_2 = arith.constant 0 : index
    %3 = vector.load %arg2[%c0, %c0_1, %c0_2] : memref<1x4x504xf32, #tpu.memory_space<vmem>>, vector<1x4x504xf32>
    %4 = vector.shape_cast %3 : vector<1x4x504xf32> to vector<4x504xf32>
    %c0_3 = arith.constant 0 : index
    %c0_4 = arith.constant 0 : index
    %5 = vector.load %arg9[%c0_3, %c0_4] : memref<4x1xf32, #tpu.memory_space<vmem>>, vector<4x1xf32>
    %cst = arith.constant dense<0.000000e+00> : vector<4xf32>
    %6 = vector.multi_reduction <add>, %4, %cst [1] : vector<4x504xf32> to vector<4xf32>
    %7 = vector.shape_cast %6 : vector<4xf32> to vector<4x1xf32>
    %8 = arith.addf %5, %7 : vector<4x1xf32>
    %c0_5 = arith.constant 0 : index
    %c0_6 = arith.constant 0 : index
    %9 = vector.load %arg9[%c0_5, %c0_6] : memref<4x1xf32, #tpu.memory_space<vmem>>, vector<4x1xf32>
    tpu.vector_store %arg9[%c0_5, %c0_6], %8 {strides = array<i32>} : memref<4x1xf32, #tpu.memory_space<vmem>>, vector<4x1xf32>,
    %c0_7 = arith.constant 0 : index
    %c0_8 = arith.constant 0 : index
    %10 = vector.load %arg10[%c0_7, %c0_8] : memref<4x1xf32, #tpu.memory_space<vmem>>, vector<4x1xf32>
    %cst_9 = arith.constant dense<0xFF800000> : vector<4xf32>
    %11 = vector.multi_reduction <maximumf>, %4, %cst_9 [1] : vector<4x504xf32> to vector<4xf32>
    %12 = vector.shape_cast %11 : vector<4xf32> to vector<4x1xf32>
    %13 = arith.maximumf %10, %12 : vector<4x1xf32>
    %c0_10 = arith.constant 0 : index
    %c0_11 = arith.constant 0 : index
    %14 = vector.load %arg10[%c0_10, %c0_11] : memref<4x1xf32, #tpu.memory_space<vmem>>, vector<4x1xf32>
    tpu.vector_store %arg10[%c0_10, %c0_11], %13 {strides = array<i32>} : memref<4x1xf32, #tpu.memory_space<vmem>>, vector<4x1xf32>,
    %c0_i32_12 = arith.constant 0 : i32
    %15 = arith.cmpi eq, %arg1, %c0_i32_12 : i32
    %16 = arith.extui %15 : i1 to i32
    %c0_i32_13 = arith.constant 0 : i32
    %17 = arith.cmpi ne, %16, %c0_i32_13 : i32
    scf.if %17 {
      %c0_14 = arith.constant 0 : index
      %c0_15 = arith.constant 0 : index
      %18 = vector.load %arg9[%c0_14, %c0_15] : memref<4x1xf32, #tpu.memory_space<vmem>>, vector<4x1xf32>
      %cst_16 = arith.constant 0.0019841271 : f32
      %19 = vector.broadcast %cst_16 : f32 to vector<4x1xf32>
      %20 = arith.mulf %18, %19 : vector<4x1xf32>
      %c0_17 = arith.constant 0 : index
      %c0_18 = arith.constant 0 : index
      %21 = vector.load %arg10[%c0_17, %c0_18] : memref<4x1xf32, #tpu.memory_space<vmem>>, vector<4x1xf32>
      %c0_19 = arith.constant 0 : index
      %c0_20 = arith.constant 0 : index
      %22 = vector.load %arg3[%c0_19, %c0_20] : memref<4x16xf32, #tpu.memory_space<vmem>>, vector<4x16xf32>
      %23 = vector.broadcast %20 : vector<4x1xf32> to vector<4x16xf32>
      %24 = arith.mulf %22, %23 : vector<4x16xf32>
      %cst_21 = arith.constant dense<0.000000e+00> : vector<16xf32>
      %25 = vector.multi_reduction <add>, %24, %cst_21 [0] : vector<4x16xf32> to vector<16xf32>
      %26 = vector.shape_cast %25 : vector<16xf32> to vector<1x16xf32>
      %c0_22 = arith.constant 0 : index
      %c0_23 = arith.constant 0 : index
      %27 = vector.load %arg4[%c0_22, %c0_23] : memref<4x16xf32, #tpu.memory_space<vmem>>, vector<4x16xf32>
      %28 = vector.broadcast %21 : vector<4x1xf32> to vector<4x16xf32>
      %29 = arith.mulf %27, %28 : vector<4x16xf32>
      %cst_24 = arith.constant dense<0.000000e+00> : vector<16xf32>
      %30 = vector.multi_reduction <add>, %29, %cst_24 [0] : vector<4x16xf32> to vector<16xf32>
      %31 = vector.shape_cast %30 : vector<16xf32> to vector<1x16xf32>
      %32 = arith.addf %26, %31 : vector<1x16xf32>
      %c0_25 = arith.constant 0 : index
      %c0_26 = arith.constant 0 : index
      %33 = vector.load %arg5[%c0_25, %c0_26] : memref<1x16xf32, #tpu.memory_space<vmem>>, vector<1x16xf32>
      %34 = arith.addf %32, %33 : vector<1x16xf32>
      %cst_27 = arith.constant 0.000000e+00 : f32
      %35 = vector.broadcast %cst_27 : f32 to vector<1x16xf32>
      %36 = arith.maximumf %34, %35 : vector<1x16xf32>
      %c0_28 = arith.constant 0 : index
      %c0_29 = arith.constant 0 : index
      %37 = vector.load %arg6[%c0_28, %c0_29] : memref<16x4xf32, #tpu.memory_space<vmem>>, vector<16x4xf32>
      %cst_30 = arith.constant dense<0.000000e+00> : vector<1x4xf32>
      %38 = tpu.matmul %36, %37, %cst_30 {dimension_numbers = #tpu.dot_dimension_numbers<[1], [0], [0], [1], [0, 0, 1, 1], [], []>} : vector<1x16xf32>, vector<16x4xf32>, vector<1x4xf32> -> vector<1x4xf32>
      %c0_31 = arith.constant 0 : index
      %c0_32 = arith.constant 0 : index
      %39 = vector.load %arg7[%c0_31, %c0_32] : memref<1x4xf32, #tpu.memory_space<vmem>>, vector<1x4xf32>
      %40 = arith.addf %38, %39 : vector<1x4xf32>
      %41 = arith.negf %40 : vector<1x4xf32>
      %42 = math.exp %41 : vector<1x4xf32>
      %cst_33 = arith.constant 1.000000e+00 : f32
      %43 = vector.broadcast %cst_33 : f32 to vector<1x4xf32>
      %44 = arith.addf %43, %42 : vector<1x4xf32>
      %45 = arith.divf %43, %44 : vector<1x4xf32>
      %c0_34 = arith.constant 0 : index
      %c0_35 = arith.constant 0 : index
      %c0_36 = arith.constant 0 : index
      %46 = vector.load %arg8[%c0_34, %c0_35, %c0_36] : memref<1x1x4xf32, #tpu.memory_space<vmem>>, vector<1x1x4xf32>
      %47 = vector.shape_cast %46 : vector<1x1x4xf32> to vector<1x4xf32>
      %48 = vector.shape_cast %45 : vector<1x4xf32> to vector<1x1x4xf32>
      tpu.vector_store %arg8[%c0_34, %c0_35, %c0_36], %48 {strides = array<i32>} : memref<1x1x4xf32, #tpu.memory_space<vmem>>, vector<1x1x4xf32>,
    } else {
    }
    return
  }
  func.func @transform_0(%arg0: i32, %arg1: i32) -> (i32, i32, i32) {
    %c0_i32 = arith.constant 0 : i32
    %c0_i32_0 = arith.constant 0 : i32
    return %arg0, %c0_i32, %arg1 : i32, i32, i32
  }
  func.func @transform_1(%arg0: i32, %arg1: i32) -> (i32, i32) {
    %c0_i32 = arith.constant 0 : i32
    %c0_i32_0 = arith.constant 0 : i32
    %c0_i32_1 = arith.constant 0 : i32
    return %c0_i32, %c0_i32_0 : i32, i32
  }
  func.func @transform_2(%arg0: i32, %arg1: i32) -> (i32, i32) {
    %c0_i32 = arith.constant 0 : i32
    %c0_i32_0 = arith.constant 0 : i32
    %c0_i32_1 = arith.constant 0 : i32
    return %c0_i32, %c0_i32_0 : i32, i32
  }
  func.func @transform_3(%arg0: i32, %arg1: i32) -> (i32, i32) {
    %c0_i32 = arith.constant 0 : i32
    %c0_i32_0 = arith.constant 0 : i32
    %c0_i32_1 = arith.constant 0 : i32
    return %c0_i32, %c0_i32_0 : i32, i32
  }
  func.func @transform_4(%arg0: i32, %arg1: i32) -> (i32, i32) {
    %c0_i32 = arith.constant 0 : i32
    %c0_i32_0 = arith.constant 0 : i32
    %c0_i32_1 = arith.constant 0 : i32
    return %c0_i32, %c0_i32_0 : i32, i32
  }
  func.func @transform_5(%arg0: i32, %arg1: i32) -> (i32, i32) {
    %c0_i32 = arith.constant 0 : i32
    %c0_i32_0 = arith.constant 0 : i32
    %c0_i32_1 = arith.constant 0 : i32
    return %c0_i32, %c0_i32_0 : i32, i32
  }
  func.func @transform_6(%arg0: i32, %arg1: i32) -> (i32, i32, i32) {
    %c0_i32 = arith.constant 0 : i32
    %c0_i32_0 = arith.constant 0 : i32
    %c0_i32_1 = arith.constant 0 : i32
    return %arg0, %c0_i32, %c0_i32_0 : i32, i32, i32
  }
}

</mosaic_0001>

<bundles_post_ra>
// kernel: tpu_custom_call.1
= control target key start
LH: loop header
LB: loop body
LE: loop exit
PB: predicated region body
PF: predicated region fallthrough
CT: control target
= control target key end

     0   :  { %11 = vsyncpa [#allocation5], 0  ;;  %s953_s0 = inlined_call_operand.hbm [shape: f32[2,4,504], index: 0, kind: input, shape index: {}]   ;;  %s954_s1 = inlined_call_operand.vmem [shape: f32[4,16], index: 1, kind: input, shape index: {}]   ;;  %s955_s2 = inlined_call_operand.vmem [shape: f32[4,16], index: 2, kind: input, shape index: {}]   ;;  %s956_s3 = inlined_call_operand.vmem [shape: f32[1,16], index: 3, kind: input, shape index: {}]   ;;  %s957_s4 = inlined_call_operand.vmem [shape: f32[16,4], index: 4, kind: input, shape index: {}]   ;;  %s958_s5 = inlined_call_operand.vmem [shape: f32[1,4], index: 5, kind: input, shape index: {}]   ;;  %s959_s6 = inlined_call_operand.hbm [shape: f32[2,1,4], index: 6, kind: output, shape index: {}]  }
   0x1   :  { %13 = vsyncpa [#allocation5 + $0x1], 0 }
   0x2   :  { %14 = vsyncpa [#allocation6], 0 }
   0x3   :  { %16 = vsyncpa [#allocation6 + $0x1], 0  ;;  %s790_s21 = smov 0   ;;  %s792_s22 = smov 0  }
   0x4   :  { %s794_s23 = smov 0   ;;  %s796_s24 = smov 0  }
   0x5   :  { %s798_s25 = smov 0   ;;  %s800_s26 = smov 0  }
   0x6 LB: > { %s540_s27 = sadd.s32 4294967295, %s747_s26   ;;  %s541_s28 = sadd.s32 4294967294, %s747_s26   ;;  %s747_s26 = sphi %s800_s26, %s22_s26   ;;  %s743_s25 = sphi %s798_s25, %s971_s25   ;;  %s739_s24 = sphi %s796_s24, %s970_s24   ;;  %s735_s23 = sphi %s794_s23, %s969_s23   ;;  %s731_s22 = sphi %s792_s22, %s968_s22   ;;  %s727_s21 = sphi %s790_s21, %s967_s21  }
   0x7   : > { %s34_s29 = sadd.s32 1, %s743_s25  ;;  %s43_s30 = sadd.s32 1, %s735_s23 }
   0x8   : > { %p36_p0 = scmp.ge.s32.totalorder %s34_s29, 2  ;;  %p50_p1 = scmp.ne.s32.totalorder %s735_s23, %s731_s22 }
   0x9   : > { %p51_p2 = scmp.eq.s32.totalorder %s747_s26, 0  ;;  %p56_p3 = scmp.ne.s32.totalorder %s731_s22, %s727_s21 }
   0xa   : > { %s973_s29 = smov (%p36_p0, %s34_s29), 0  ;;  %p57_p5 = scmp.eq.s32.totalorder %s540_s27, 0 }
   0xb   : > { %p831_p4 = por %p51_p2, %p50_p1  ;;  %s38_s8 = ssub.s32 %s743_s25, %s973_s29 }
   0xc   : > { %p185_p6 = scmp.eq.s32.totalorder %s540_s27, 1  ;;  %p41_p7 = scmp.eq.s32.totalorder %s38_s8, 0 }
   0xd   : > { %p837_p8 = por %p57_p5, %p56_p3  ;;  %p191_p10 = scmp.eq.s32.totalorder %s541_s28, 1 }
   0xe   : > { %p841_p9 = por %p185_p6, %p50_p1  ;;  %p577_p13 = scmp.lt.s32.totalorder %s747_s26, 2 }
   0xf   : > { %s846_s11 = scalar_select %p41_p7, %s735_s23, %s43_s30  }
  0x10   : > { %p848_p11 = por %p191_p10, %p56_p3  ;;  %s226_s13 = sand.u32 1, %s735_s23  }
  0x11   : > { %s544_s14 = sshll.u32 %s226_s13, 4  ;;  %s554_s15 = sshll.u32 %s743_s25, 8 }
  0x12   : > { %s963_s12 = scalar_select %p848_p11, 1, 0 }
  0x13   : > { %s238_s18 = scalar_lea.hbm %s953_s0, %s554_s15  ;;  %s230_s19 = scalar_lea.vmem [#allocation4], %s544_s14 }
  0x14   : > { %s240_s20 = sshll.u32 %s230_s19, 4  ;;  %p861_p0 = pnand %p577_p13, %p831_p4  ;;  %s241_s20 = int_to_ptr.vmem [resolvable:$true] %s240_s20 }
  0x15   : > { %p547_p1 = scmp.ge.s32.totalorder %s747_s26, 1  ;;  %p245_p2 = scmp.lt.s32.totalorder %s747_s26, 3 }
  0x16   : > { %s227_s28 = scalar_lea.sflag [#allocation5], %s226_s13  ;;  %p641_p3 = pneg %p861_p0 }
  0x17   : > { %s652_s30 = scalar_lea.vmem %s241_s20, 256  ;;  %s749_s8 = smov [#allocation4]  }
  0x18   : > { %p653_p5 = scmp.ne.s32.totalorder %s241_s20, %s652_s30  ;;  %s657_s15 = sshll.u32 %s749_s8, 4  ;;  %s658_s15 = int_to_ptr.vmem [resolvable:$false] %s657_s15 }
  0x19   : > { %s659_s14 = scalar_lea.vmem %s658_s15, 512  ;;  %p660_p10 = scmp.lt.s32.totalorder %s241_s20, %s658_s15 }
  0x1a   : > { %p655_p6 = pnand %p653_p5, %p641_p3  ;;  %p661_p12 = scmp.lt.s32.totalorder %s659_s14, %s652_s30 }
  0x1c   : > { %p656_p7 = pneg %p655_p6  ;;  %p662_p4 = por %p661_p12, %p660_p10 }
  0x1e   : > { %p663_p13 = pnand %p662_p4, %p656_p7 }
  0x20   : > { %666 = shalt.err (!%p663_p13)
}
  0x21   : > { %572 = dma.hbm_to_vmem [thread:$0]  (!%p861_p0), %s238_s18, 256, %s241_s20, %s227_s28  }
  0x22   : > { %p246_p11 = pnand %p547_p1, %p245_p2 }
  0x23   : > { %s876_s7 = sand.u32 (!%p246_p11), 1, %s731_s22  }
  0x24   : > { %249 = sbr.rel (%p246_p11) target bundleno = 591 (0x24f), region = 44  ;;  %s548_s13 = sshll.u32 (!%p246_p11), %s876_s7, 4 }
  0x25   : > { %s252_s16 = scalar_lea.sflag (!%p246_p11), [#allocation5], %s876_s7  ;;  %s255_s17 = scalar_lea.vmem (!%p246_p11), [#allocation4], %s548_s13 }
  0x29   : > { %718 = dma.done.wait (%p837_p8), %s252_s16, 256  }
  0x2a   : > { %720 = vsyncadd (%p837_p8), %s252_s16, 4294967040  ;;  %vm288_vm0 = vcmask 3072   ;;  %v750_v0 = vmov 0.0   ;;  %vm300_vm1 = vcmask 1043456   ;;  %v291_v1 = vld [vmem:[%s255_s17] sm:$0xff]  ;;  %v292_v2 = vld [vmem:[%s255_s17 + $0x8] sm:$0xff] }
  0x2b   : > { %289 = vst.msk [vmem:[#allocation2] sm:$0xf] %vm288_vm0, %v750_v0  ;;  %558 = vmatprep.subr.mxu0 %v750_v0  ;;  %v296_v3 = vcombine.high %v291_v1, %v291_v1  ;;  %v297_v4 = vcombine.high %v292_v2, %v292_v2  ;;  %v301_v5 = vsel %vm300_vm1, %v291_v1, 0.0  ;;  %v304_v6 = vsel %vm300_vm1, %v292_v2, 0.0  ;;  %v366_v30 = vld [vmem:[%s957_s4 + $0x8] sm:$0xff]  ;;  %v365_v31 = vld [vmem:[%s957_s4] sm:$0xff] }
  0x2c   : > { %vm306_vm2 = vcmask 977920   ;;  %v315_v7 = vsel %vm300_vm1, %v291_v1, -inf  ;;  %v317_v11 = vsel %vm300_vm1, %v292_v2, -inf  ;;  %v751_v19 = vmov -inf   ;;  %559 = vmatpush3.msra.mxu0 %v366_v30  ;;  %v332_v32 = vld [vmem:[%s954_s1] sm:$0xf] }
  0x2d   : > { %v302_v8 = vsel %vm300_vm1, %v296_v3, 0.0  ;;  %v318_v9 = vsel %vm306_vm2, %v297_v4, -inf  ;;  %v316_v10 = vsel %vm300_vm1, %v296_v3, -inf  ;;  %v307_v13 = vsel %vm306_vm2, %v297_v4, 0.0  ;;  %290 = vst.msk [vmem:[#allocation3] sm:$0xf] %vm288_vm0, %v751_v19  ;;  %560 = vmatprep.subr.mxu0 %v750_v0 }
  0x2e   : > { %v303_v12 = vadd.f32 %v302_v8, %v301_v5  ;;  %v319_v15 = vmax.f32 %v315_v7, %v316_v10  ;;  %v320_v16 = vmax.f32 %v317_v11, %v318_v9  ;;  %v752_v20 = vmov 0   ;;  %561 = vmatpush3.msra.mxu0 %v365_v31  ;;  %v347_v35 = vld [vmem:[%s955_s2] sm:$0xf]  ;;  %s551_s17 = sshll.u32 %s739_s24, 4  ;;  %s282_s9 = scalar_lea.vmem [#allocation7], %s876_s7 }
  0x2f   : > { %631 = vset.pattern.permute.xlu1 %v752_v20  ;;  %632 = vset.pattern.permute.xlu0 %v752_v20  ;;  %vm753_vm3 = vmmov 0   ;;  %vm339_vm4 = vcmask 125952   ;;  %v362_v52 = vld [vmem:[%s956_s3] sm:$0x1]  ;;  %vm368_vm5 = vcmask 130048   ;;  %s463_s18 = sshll.u32 %s282_s9, 4  ;;  %s911_s27 = scalar_lea.hbm %s959_s6, %s551_s17  ;;  %s464_s18 = int_to_ptr.vmem [resolvable:$true] %s463_s18 }
  0x30   : > { %v305_v14 = vadd.f32 %v304_v6, %v303_v12  ;;  %v321_v18 = vmax.f32 %v319_v15, %v320_v16  ;;  %562 = vmatprep.mubr.msk.f32.mxu0 %vm753_vm3, %v750_v0  ;;  %v367_v56 = vld [vmem:[%s958_s5] sm:$0x1]  ;;  %vm448_vm6 = vcmask 24576   ;;  %s451_s28 = scalar_lea.sflag [#allocation6], %s876_s7  ;;  %s667_s30 = scalar_lea.vmem %s464_s18, 16 }
  0x31   : > { %p668_p8 = scmp.ne.s32.totalorder %s464_s18, %s667_s30  ;;  %s754_s8 = smov [#allocation7]  }
  0x32   : > { %v308_v17 = vadd.f32 %v307_v13, %v305_v14  ;;  %v293_v21 = vld [vmem:[#allocation2] sm:$0xf]  ;;  %s671_s15 = sshll.u32 %s754_s8, 4  ;;  %s672_s15 = int_to_ptr.vmem [resolvable:$false] %s671_s15 }
  0x33   : > { %p669_p11 = pnand %p668_p8, %p841_p9  ;;  %s673_s24 = scalar_lea.vmem %s672_s15, 32 }
  0x34   : > { %309 = vadd.xlane.f32.xlu0 %v308_v17  ;;  %v314_v24 = vld [vmem:[#allocation3] sm:$0xf]  ;;  %p674_p0 = scmp.lt.s32.totalorder %s464_s18, %s672_s15  ;;  %p675_p1 = scmp.lt.s32.totalorder %s673_s24, %s667_s30 }
  0x35   : > { %p670_p12 = pneg %p669_p11 }
  0x36   : > { %p676_p2 = por %p675_p1, %p674_p0 }
  0x38   : > { %322 = vmax.xlane.f32.xlu0 %v321_v18  ;;  %p677_p3 = pnand %p676_p2, %p670_p12 }
  0xbd   : > { %v310_v22 = vpop.xlane.xlu0 %309 }
  0xbe   : > { %v311_v23 = vadd.f32 %v310_v22, %v293_v21 }
  0xc0   : > { %313 = vst.msk [vmem:[#allocation2] sm:$0xf] %vm288_vm0, %v311_v23 }
  0xc1   : > { %v323_v25 = vpop.xlane.xlu0 %322 }
  0xc2   : > { %v324_v26 = vmax.f32 %v314_v24, %v323_v25 }
  0xc4   : > { %325 = vst.msk [vmem:[#allocation3] sm:$0xf] %vm288_vm0, %v324_v26 }
  0xc7   : > { %v329_v27 = vld [vmem:[#allocation2] sm:$0xf] }
  0xc8   : > { %v330_v28 = vmul.f32 0.001984127, %v329_v27 }
  0xca   : > { %335 = vperm.xlu1 %631, %v330_v28  }
  0xcb   : > { %v331_v29 = vld [vmem:[#allocation3] sm:$0xf] }
  0xce   : > { %350 = vperm.xlu1 %631, %v331_v29  }
 0x145   : > { %v336_v33 = vpop.permute.xlu1 %335 }
 0x146   : > { %v338_v34 = vmul.f32 %v336_v33, %v332_v32 }
 0x148   : > { %v340_v36 = vsel %vm339_vm4, %v338_v34, 0.0 }
 0x149   : > { %v341_v37 = vrot.slane %v340_v36, 4  ;;  %v351_v38 = vpop.permute.xlu1 %350 }
 0x14a   : > { %v353_v39 = vmul.f32 %v351_v38, %v347_v35 }
 0x14b   : > { %v342_v40 = vadd.f32 %v341_v37, %v340_v36 }
 0x14c   : > { %v354_v41 = vsel %vm339_vm4, %v353_v39, 0.0 }
 0x14d   : > { %v343_v42 = vrot.slane %v342_v40, 2  ;;  %v355_v43 = vrot.slane %v354_v41, 4 }
 0x14f   : > { %v344_v44 = vadd.f32 %v343_v42, %v342_v40  ;;  %v356_v45 = vadd.f32 %v355_v43, %v354_v41 }
 0x151   : > { %v357_v46 = vrot.slane %v356_v45, 2  ;;  %v345_v47 = vrot.slane %v344_v44, 1 }
 0x153   : > { %v358_v48 = vadd.f32 %v357_v46, %v356_v45  ;;  %v346_v50 = vadd.f32 %v345_v47, %v344_v44 }
 0x155   : > { %v359_v49 = vrot.slane %v358_v48, 1 }
 0x157   : > { %v360_v51 = vadd.f32 %v359_v49, %v358_v48 }
 0x159   : > { %v361_v53 = vadd.f32 %v360_v51, %v346_v50 }
 0x15b   : > { %v363_v54 = vadd.f32 %v362_v52, %v361_v53 }
 0x15d   : > { %v364_v55 = vmax.f32 %v363_v54, 0.0 }
 0x15f   : > { %563 = vmatmul.mubr.msk.f32.vlgmr.msra.gmra.mxu0 %vm368_vm5, %v364_v55 }
 0x21f   : > { %v438_v57 = vpop.f32.mrf.mxu0 }
 0x220   : > { %v439_v58 = vadd.f32 %v438_v57, %v367_v56 }
 0x221   : > { %v564_v59 = vpop.f32.mrf.mxu0 }
 0x222   : > { %v550_v60 = vmul.f32 -1.442695, %v439_v58 }
 0x224   : > { %635 = vpow2.f32 %v550_v60 }
 0x231   : > { %v636_v61 = vpop.eup %635 }
 0x232   : > { %v445_v62 = vadd.f32 1.0, %v636_v61 }
 0x234   : > { %637 = vrcp.f32 %v445_v62 }
 0x241   : > { %v638_v63 = vpop.eup %637 }
 0x242   : > { %449 = vst.msk [vmem:[%s282_s9] sm:$0x1] %vm448_vm6, %v638_v63 }
 0x243   : > { %680 = shalt.err (!%p677_p3)
}
 0x244   : > { %s681_s14 = scalar_lea.hbm %s911_s27, 16  ;;  %s685_s16 = scalar_lea.hbm %s959_s6, 32 }
 0x245   : > { %p682_p5 = scmp.ne.s32.totalorder %s911_s27, %s681_s14  ;;  %p686_p10 = scmp.lt.s32.totalorder %s911_s27, %s959_s6 }
 0x246   : > { %p687_p4 = scmp.lt.s32.totalorder %s685_s16, %s681_s14 }
 0x247   : > { %p683_p6 = pnand %p682_p5, %p841_p9 }
 0x248   : > { %p688_p13 = por %p687_p4, %p686_p10 }
 0x249   : > { %p684_p7 = pneg %p683_p6 }
 0x24b   : > { %p689_p8 = pnand %p688_p13, %p684_p7 }
 0x24d   : > { %692 = shalt.err (!%p689_p8)
}
 0x24e   : > { %567 = dma.vmem_to_hbm [thread:$0]  (%p841_p9), %s464_s18, 16, %s911_s27, %s451_s28  }
 0x24f PF: > { %s475_s19 = sand.u32 1, %s727_s21   ;;  %p965_p11 = scmp.ne.s32.totalorder %s963_s12, 0 }
 0x250   : > { %p966_p12 = scmp.ge.s32.totalorder %s747_s26, 2  ;;  %s476_s20 = scalar_lea.sflag [#allocation6], %s475_s19 }
 0x252   : > { %p574_p0 = pnand %p966_p12, %p965_p11 }
 0x254   : > { %p575_p1 = pneg %p574_p0 }
 0x256   : > { %722 = dma.done.wait (%p575_p1), %s476_s20, 16  }
 0x257   : > { %724 = vsyncadd (%p575_p1), %s476_s20, 4294967280  ;;  %s22_s26 = sadd.s32 1, %s747_s26   ;;  %s967_s21 = smov %s731_s22 }
 0x258   : > { %p19_p2 = scmp.ge.s32.totalorder %s22_s26, 4   ;;  %s968_s22 = smov %s735_s23 }
 0x259   : > { %s969_s23 = smov %s846_s11  ;;  %s970_s24 = smov %s743_s25 }
 0x25a   : > { %s971_s25 = smov %s973_s29  ;;  %21 = sbr.rel (!%p19_p2) target bundleno = 6 (0x6), region = 97 }
 0x25f   :  { %480 = vsyncpa [#allocation5], 1 }
 0x260   :  { %482 = vsyncpa [#allocation5 + $0x1], 1 }
 0x261   :  { %483 = vsyncpa [#allocation6], 1 }
 0x262   :  { %485 = vsyncpa [#allocation6 + $0x1], 1 }

</bundles_post_ra>
